<compile_context>
chip_gen: v6e
topology: v6e:2x2x1
jax: 0.10.0
libtpu: 0.0.40
codegen_flags: <defaults>
</compile_context>

<pallas_src>
import jax
import jax.numpy as jnp
from jax import lax
from jax.experimental import pallas as pl
from jax.experimental.pallas import tpu as pltpu


_PACK = 8                                   # rows folded per packed row (one f32 sublane group)
_GRIDLESS_VMEM_BUDGET = 2 * 1024 * 1024     # bytes; conservative vs 16 MiB scoped (v5e)
_MAX_PACKED_W_BYTES = 2 * 1024 * 1024       # keep the resident packed weight small


def _linear_kernel_kn(x_ref, w_ref, b_ref, o_ref):
    # x: [TB, K], w: [K, N], b: [1, N]  ->  o: [TB, N]   (MXU, f32 accumulate)
    acc = jnp.dot(x_ref[...], w_ref[...], preferred_element_type=jnp.float32)
    o_ref[...] = (acc + b_ref[...]).astype(o_ref.dtype)


def _linear_kernel_nk(x_ref, w_ref, b_ref, o_ref):
    # x: [TB, K], w: [N, K] (PyTorch nn.Linear layout), b: [1, N]  ->  o: [TB, N]
    acc = lax.dot_general(
        x_ref[...], w_ref[...],
        dimension_numbers=(((1,), (1,)), ((), ())),
        preferred_element_type=jnp.float32,
    )
    o_ref[...] = (acc + b_ref[...]).astype(o_ref.dtype)


def _vmem_padded_bytes(shape, itemsize=4):
    """f32 VMEM footprint of a 2-D block after (8, 128) sublane/lane padding."""
    r, c = shape
    return (-(-r // 8) * 8) * (-(-c // 128) * 128) * itemsize


def _tile_rows_from(batch_tile):
    # Floor 1024 rows (~86% of HBM roofline measured), cap 16384, multiple of 64
    # so that the packed tile (rows // 8) stays a multiple of 8.
    bt = min(max(int(batch_tile), 1024), 16384)
    return (bt // 64) * 64


def _launch(kernel, x2d, w2d, b2d, tile_rows):
    """Row-tiled (or gridless) pallas_call computing o = kernel(x, w, b)."""
    rows, k = x2d.shape
    n = b2d.shape[1]
    out_shape = jax.ShapeDtypeStruct((rows, n), x2d.dtype)

    gridless_bytes = (
        _vmem_padded_bytes((rows, k)) + _vmem_padded_bytes((rows, n))
        + _vmem_padded_bytes(w2d.shape) + _vmem_padded_bytes(b2d.shape))

    if rows <= tile_rows and gridless_bytes <= _GRIDLESS_VMEM_BUDGET:
        # Single-block path: no grid, no software pipeline, one DMA in/out.
        vmem = pltpu.MemorySpace.VMEM
        return pl.pallas_call(
            kernel,
            out_shape=out_shape,
            in_specs=[pl.BlockSpec(memory_space=vmem),
                      pl.BlockSpec(memory_space=vmem),
                      pl.BlockSpec(memory_space=vmem)],
            out_specs=pl.BlockSpec(memory_space=vmem),
        )(x2d, w2d, b2d)

    # Batch-tiled, pipelined path.  The row dim is NOT padded: Pallas masks the
    # stores of the ragged last block, and the garbage rows read there only
    # feed those masked rows (rows are independent — no cross-row reduction).
    n_tiles = pl.cdiv(rows, tile_rows)
    w_shape = w2d.shape
    b_shape = b2d.shape
    return pl.pallas_call(
        kernel,
        out_shape=out_shape,
        grid_spec=pltpu.PrefetchScalarGridSpec(
            num_scalar_prefetch=0,
            grid=(n_tiles,),
            in_specs=[
                pl.BlockSpec((tile_rows, k), lambda i: (i, 0)),
                pl.BlockSpec(w_shape, lambda i: (0, 0)),   # resident across steps
                pl.BlockSpec(b_shape, lambda i: (0, 0)),   # resident across steps
            ],
            out_specs=pl.BlockSpec((tile_rows, n), lambda i: (i, 0)),
        ),
        # No-op on single-TC v5e/v6e; shards the independent batch tiles across
        # both TensorCores on v7x (n_tiles >= 2 whenever rows > tile_rows).
        compiler_params=pltpu.CompilerParams(
            dimension_semantics=("parallel",)),
    )(x2d, w2d, b2d)


def linear_regression_forward(x, weight, bias, *, batch_tile=4096):
    """torch.nn.Linear forward: x @ weight.T + bias.

    x: [B, D_in]; weight: [D_out, D_in] (PyTorch layout); bias: [D_out].
    """
    B, D_in = x.shape
    D_out = weight.shape[0]
    tile_rows = _tile_rows_from(batch_tile)

    packed_w_bytes = (_PACK * D_in) * (_PACK * D_out) * 4
    if D_out >= 128 or packed_w_bytes > _MAX_PACKED_W_BYTES:
        # Output already lane-dense (or packed weight too big to keep resident):
        # consume the PyTorch [D_out, D_in] weight directly, contracting dim 1
        # of both operands on the MXU.
        return _launch(_linear_kernel_nk, x, weight,
                       bias.reshape(1, D_out), tile_rows)

    # Lane-dense repack: fold 8 consecutive rows per packed row so the output
    # last dim becomes 8*D_out (>= 128 for this module) and stores go unmasked.
    b_round = -(-B // _PACK) * _PACK
    pad = b_round - B
    if pad:
        # <= 7 rows, only when B % 8 != 0 (a tiny separate tail call could
        # avoid even this copy; not worth it at these sizes).
        x = jnp.pad(x, ((0, pad), (0, 0)))
    xp = x.reshape(b_round // _PACK, _PACK * D_in)                  # free reshape
    w_big = jnp.kron(jnp.eye(_PACK, dtype=weight.dtype), weight.T)  # [8*D_in, 8*D_out] block-diag
    b_big = jnp.tile(bias, _PACK).reshape(1, _PACK * D_out)         # [1, 8*D_out]

    out_p = _launch(_linear_kernel_kn, xp, w_big, b_big, tile_rows // _PACK)
    out = out_p.reshape(b_round, D_out)                             # free reshape
    return out[:B] if pad else out


if __name__ == "__main__":
    # Shapes consistent with the module: input_dim=32, output_dim=16, batch=8.
    key = jax.random.PRNGKey(0)
    k_x, k_w, k_b, k_x2 = jax.random.split(key, 4)

    batch, input_dim, output_dim = 8, 32, 16
    x = jax.random.normal(k_x, (batch, input_dim), dtype=jnp.float32)
    weight = jax.random.normal(k_w, (output_dim, input_dim), dtype=jnp.float32) * 0.1
    bias = jax.random.normal(k_b, (output_dim,), dtype=jnp.float32) * 0.1

    # Small-batch (gridless, lane-dense packed) path.
    out = linear_regression_forward(x, weight, bias)
    jax.block_until_ready(out)
    ref = x @ weight.T + bias
    assert out.shape == (batch, output_dim)
    assert jnp.allclose(out, ref, atol=1e-5, rtol=1e-5)

    # Batch-tiled grid path: ragged 8-row tail (B % 8 = 4), resident weight/bias,
    # ragged last grid block handled by Pallas masking (no full pad/slice).
    big_b = 2500
    x_big = jax.random.normal(k_x2, (big_b, input_dim), dtype=jnp.float32)
    out_big = linear_regression_forward(x_big, weight, bias, batch_tile=1024)
    jax.block_until_ready(out_big)
    ref_big = x_big @ weight.T + bias
    assert out_big.shape == (big_b, output_dim)
    assert jnp.allclose(out_big, ref_big, atol=1e-4, rtol=1e-4)

    print("KERNEL_OK")
</pallas_src>

<mosaic_0001>
module attributes {stable_mosaic.version = 11 : i64} {
  func.func @_linear_kernel_kn(%arg0: memref<1x256xf32, #tpu.memory_space<vmem>>, %arg1: memref<256x128xf32, #tpu.memory_space<vmem>>, %arg2: memref<1x128xf32, #tpu.memory_space<vmem>>, %arg3: memref<1x128xf32, #tpu.memory_space<vmem>>) attributes {dimension_semantics = [], scalar_prefetch = 0 : i64, scratch_operands = 0 : i64, tpu.core_type = #tpu.core_type<tc>} {
    %c0 = arith.constant 0 : index
    %c0_0 = arith.constant 0 : index
    %0 = vector.load %arg0[%c0, %c0_0] : memref<1x256xf32, #tpu.memory_space<vmem>>, vector<1x256xf32>
    %c0_1 = arith.constant 0 : index
    %c0_2 = arith.constant 0 : index
    %1 = vector.load %arg1[%c0_1, %c0_2] : memref<256x128xf32, #tpu.memory_space<vmem>>, vector<256x128xf32>
    %cst = arith.constant dense<0.000000e+00> : vector<1x128xf32>
    %2 = tpu.matmul %0, %1, %cst {dimension_numbers = #tpu.dot_dimension_numbers<[1], [0], [0], [1], [0, 0, 1, 1], [], []>} : vector<1x256xf32>, vector<256x128xf32>, vector<1x128xf32> -> vector<1x128xf32>
    %c0_3 = arith.constant 0 : index
    %c0_4 = arith.constant 0 : index
    %3 = vector.load %arg2[%c0_3, %c0_4] : memref<1x128xf32, #tpu.memory_space<vmem>>, vector<1x128xf32>
    %4 = arith.addf %2, %3 : vector<1x128xf32>
    %c0_5 = arith.constant 0 : index
    %c0_6 = arith.constant 0 : index
    %5 = vector.load %arg3[%c0_5, %c0_6] : memref<1x128xf32, #tpu.memory_space<vmem>>, vector<1x128xf32>
    tpu.vector_store %arg3[%c0_5, %c0_6], %4 {strides = array<i32>} : memref<1x128xf32, #tpu.memory_space<vmem>>, vector<1x128xf32>,
    return
  }
}

</mosaic_0001>

<bundles_post_ra>
// kernel: tpu_custom_call.1
= control target key start
LH: loop header
LB: loop body
LE: loop exit
PB: predicated region body
PF: predicated region fallthrough
CT: control target
= control target key end

     0   :  { %8 = vsyncpa [#allocation3], 0  ;;  %s316_s0 = inlined_call_operand.hbm [shape: f32[1,256], index: 0, kind: input, shape index: {}]   ;;  %s317_s1 = inlined_call_operand.hbm [shape: f32[256,128], index: 1, kind: input, shape index: {}]   ;;  %s318_s2 = inlined_call_operand.vmem [shape: f32[1,128], index: 2, kind: input, shape index: {}]   ;;  %s319_s3 = inlined_call_operand.hbm [shape: f32[1,128], index: 3, kind: output, shape index: {}]  }
   0x1   :  { %9 = vsyncpa [#allocation6], 0 }
   0x2   :  { %10 = vsyncpa [#allocation4], 0  ;;  %s279_s12 = smov [#allocation2]   ;;  %s280_s14 = smov [#allocation5]  }
   0x3   :  { %s17_s13 = sshll.u32 %s279_s12, 4  ;;  %s26_s15 = sshll.u32 %s280_s14, 4  ;;  %s18_s13 = int_to_ptr.vmem [resolvable:$true] %s17_s13  ;;  %s27_s15 = int_to_ptr.vmem [resolvable:$true] %s26_s15 }
   0x4   :  { %s221_s16 = scalar_lea.vmem %s18_s13, 32  ;;  %p226_p1 = scmp.lt.s32.totalorder %s18_s13, %s18_s13 }
   0x5   :  { %p222_p0 = scmp.ne.s32.totalorder %s18_s13, %s221_s16  ;;  %p227_p2 = scmp.lt.s32.totalorder %s221_s16, %s221_s16 }
   0x7   :  { %p228_p3 = por %p227_p2, %p226_p1 }
   0x9   :  { %p229_p4 = pnand %p228_p3, %p222_p0 }
   0xb   :  { %232 = shalt.err (!%p229_p4)
}
   0xc   :  { %20 = dma.hbm_to_vmem [thread:$0]  %s316_s0, 32, %s18_s13, [#allocation3]  }
   0xd   :  { %s241_s19 = scalar_lea.vmem %s27_s15, 4096  ;;  %p246_p6 = scmp.lt.s32.totalorder %s27_s15, %s27_s15 }
   0xe   :  { %p242_p5 = scmp.ne.s32.totalorder %s27_s15, %s241_s19  ;;  %p247_p7 = scmp.lt.s32.totalorder %s241_s19, %s241_s19 }
  0x10   :  { %p248_p8 = por %p247_p7, %p246_p6 }
  0x12   :  { %p249_p9 = pnand %p248_p8, %p242_p5 }
  0x14   :  { %252 = shalt.err (!%p249_p9)
}
  0x15   :  { %s281_s20 = smov 128   ;;  %s282_s21 = smov 8  }
  0x16   :  { %32 = dma.hbm_to_vmem [thread:$0]  %s317_s1, 4096, %s27_s15, [#allocation6], %s281_s20, %s281_s20, %s282_s21  }
  0x17   :  { %273 = dma.done.wait [#allocation3], 32  }
  0x18   :  { %274 = vsyncadd [#allocation3], 4294967264 }
  0x19   :  { %275 = dma.done.wait [#allocation6], 4096  }
  0x1a   :  { %276 = vsyncadd [#allocation6], 4294963200  ;;  %v76_v0 = vlaneseq  ;;  %v73_v1 = vld [vmem:[#allocation5 + $0xf8] sm:$0xff]  ;;  %v72_v3 = vld [vmem:[#allocation5 + $0xf0] sm:$0xff]  ;;  %s283_s24 = smov [#allocation7]  }
  0x1b   :  { %v57_v2 = vld [vmem:[#allocation5 + $0x78] sm:$0xff]  ;;  %173 = vmatprep.subr.mxu0 %v73_v1  ;;  %v56_v4 = vld [vmem:[#allocation5 + $0x70] sm:$0xff]  ;;  %v71_v5 = vld [vmem:[#allocation5 + $0xe8] sm:$0xff]  ;;  %s163_s25 = sshll.u32 %s283_s24, 4  ;;  %s164_s25 = int_to_ptr.vmem [resolvable:$true] %s163_s25 }
  0x1c   :  { %174 = vmatpush3.msra.mxu0 %v57_v2  ;;  %v55_v6 = vld [vmem:[#allocation5 + $0x68] sm:$0xff]  ;;  %v77_v7 = vshrl.u32 %v76_v0, 7  ;;  %v70_v8 = vld [vmem:[#allocation5 + $0xe0] sm:$0xff]  ;;  %v69_v10 = vld [vmem:[#allocation5 + $0xd8] sm:$0xff]  ;;  %s253_s26 = scalar_lea.vmem %s164_s25, 16  ;;  %s257_s27 = scalar_lea.vmem %s164_s25, 32 }
  0x1d   :  { %175 = vmatprep.subr.mxu0 %v72_v3  ;;  %v54_v9 = vld [vmem:[#allocation5 + $0x60] sm:$0xff]  ;;  %v53_v11 = vld [vmem:[#allocation5 + $0x58] sm:$0xff]  ;;  %v68_v13 = vld [vmem:[#allocation5 + $0xd0] sm:$0xff]  ;;  %p254_p10 = scmp.ne.s32.totalorder %s164_s25, %s253_s26  ;;  %p258_p11 = scmp.lt.s32.totalorder %s164_s25, %s164_s25 }
  0x1e   :  { %176 = vmatpush3.msra.mxu0 %v56_v4  ;;  %v82_v12 = vsub.s32 1, %v77_v7  ;;  %v52_v14 = vld [vmem:[#allocation5 + $0x50] sm:$0xff]  ;;  %v67_v15 = vld [vmem:[#allocation5 + $0xc8] sm:$0xff]  ;;  %v41_v16 = vld [vmem:[#allocation2] sm:$0x3]  ;;  %v78_v33 = vsub.s32 0, %v77_v7  ;;  %p259_p12 = scmp.lt.s32.totalorder %s257_s27, %s253_s26 }
  0x1f   :  { %177 = vmatprep.subr.mxu0 %v71_v5  ;;  %v51_v17 = vld [vmem:[#allocation5 + $0x48] sm:$0xff]  ;;  %v66_v19 = vld [vmem:[#allocation5 + $0xc0] sm:$0xff]  ;;  %v65_v21 = vld [vmem:[#allocation5 + $0xb8] sm:$0xff] }
  0x20   :  { %178 = vmatpush3.msra.mxu0 %v55_v6  ;;  %v83_v18 = vrot.slane %v41_v16, %v82_v12  ;;  %v50_v20 = vld [vmem:[#allocation5 + $0x40] sm:$0xff]  ;;  %v49_v22 = vld [vmem:[#allocation5 + $0x38] sm:$0xff]  ;;  %v64_v23 = vld [vmem:[#allocation5 + $0xb0] sm:$0xff]  ;;  %v79_v38 = vrot.slane %v41_v16, %v78_v33  ;;  %p260_p13 = por %p259_p12, %p258_p11 }
  0x21   :  { %179 = vmatprep.subr.mxu0 %v70_v8  ;;  %v48_v24 = vld [vmem:[#allocation5 + $0x30] sm:$0xff]  ;;  %v63_v25 = vld [vmem:[#allocation5 + $0xa8] sm:$0xff]  ;;  %v62_v27 = vld [vmem:[#allocation5 + $0xa0] sm:$0xff] }
  0x22   :  { %180 = vmatpush3.msra.mxu0 %v54_v9  ;;  %150 = vmatprep.mubr.f32.mxu0 %v83_v18  ;;  %v47_v26 = vld [vmem:[#allocation5 + $0x28] sm:$0xff]  ;;  %v46_v28 = vld [vmem:[#allocation5 + $0x20] sm:$0xff]  ;;  %v61_v29 = vld [vmem:[#allocation5 + $0x98] sm:$0xff]  ;;  %p261_p0 = pnand %p260_p13, %p254_p10 }
  0x23   :  { %181 = vmatprep.subr.mxu0 %v69_v10  ;;  %v45_v30 = vld [vmem:[#allocation5 + $0x18] sm:$0xff]  ;;  %v60_v31 = vld [vmem:[#allocation5 + $0x90] sm:$0xff]  ;;  %v59_v34 = vld [vmem:[#allocation5 + $0x88] sm:$0xff] }
  0x24   :  { %182 = vmatpush3.msra.mxu0 %v53_v11  ;;  %v44_v32 = vld [vmem:[#allocation5 + $0x10] sm:$0xff]  ;;  %v43_v35 = vld [vmem:[#allocation5 + $0x8] sm:$0xff]  ;;  %v58_v36 = vld [vmem:[#allocation5 + $0x80] sm:$0xff] }
  0x25   :  { %183 = vmatprep.subr.mxu0 %v68_v13  ;;  %v42_v37 = vld [vmem:[#allocation5] sm:$0xff]  ;;  %v74_v40 = vld [vmem:[%s318_s2] sm:$0x1] }
  0x26   :  { %184 = vmatpush3.msra.mxu0 %v52_v14 }
  0x27   :  { %185 = vmatprep.subr.mxu0 %v67_v15 }
  0x28   :  { %186 = vmatpush3.msra.mxu0 %v51_v17 }
  0x29   :  { %187 = vmatprep.subr.mxu0 %v66_v19 }
  0x2a   :  { %188 = vmatpush3.msra.mxu0 %v50_v20 }
  0x2b   :  { %189 = vmatprep.subr.mxu0 %v65_v21 }
  0x2c   :  { %190 = vmatpush3.msra.mxu0 %v49_v22 }
  0x2d   :  { %191 = vmatprep.subr.mxu0 %v64_v23 }
  0x2e   :  { %192 = vmatpush3.msra.mxu0 %v48_v24 }
  0x2f   :  { %193 = vmatprep.subr.mxu0 %v63_v25 }
  0x30   :  { %194 = vmatpush3.msra.mxu0 %v47_v26 }
  0x31   :  { %195 = vmatprep.subr.mxu0 %v62_v27 }
  0x32   :  { %196 = vmatpush3.msra.mxu0 %v46_v28 }
  0x33   :  { %197 = vmatprep.subr.mxu0 %v61_v29 }
  0x34   :  { %198 = vmatpush3.msra.mxu0 %v45_v30 }
  0x35   :  { %199 = vmatprep.subr.mxu0 %v60_v31 }
  0x36   :  { %200 = vmatpush3.msra.mxu0 %v44_v32 }
  0x37   :  { %201 = vmatprep.subr.mxu0 %v59_v34 }
  0x38   :  { %202 = vmatpush3.msra.mxu0 %v43_v35 }
  0x39   :  { %203 = vmatprep.subr.mxu0 %v58_v36 }
  0x3a   :  { %204 = vmatpush3.msra.mxu0 %v42_v37 }
  0x3b   :  { %151 = vmatmul.mubr.f32.vlgmr.msra.gmra.mxu0 %v79_v38 }
  0xfb   :  { %v205_v39 = vpop.f32.mrf.mxu0 }
  0xfd   :  { %v206_v41 = vpop.f32.mrf.mxu0 }
  0xfe   :  { %v207_v42 = vadd.f32 %v206_v41, %v205_v39 }
 0x100   :  { %v153_v43 = vadd.f32 %v207_v42, %v74_v40 }
 0x102   :  { %156 = vst [vmem:[#allocation7] sm:$0x1] %v153_v43 }
 0x103   :  { %264 = shalt.err (!%p261_p0)
}
 0x104   :  { %166 = dma.vmem_to_hbm [thread:$0]  %s164_s25, 16, %s319_s3, [#allocation4]  }
 0x105   :  { %277 = dma.done.wait [#allocation4], 16  }
 0x106   :  { %278 = vsyncadd [#allocation4], 4294967280 }
 0x107   :  { %170 = vsyncpa [#allocation3], 1 }
 0x108   :  { %171 = vsyncpa [#allocation6], 1 }
 0x109   :  { %172 = vsyncpa [#allocation4], 1 }

</bundles_post_ra>
